<compile_context>
chip_gen: v7x
topology: tpu7x:2x2x1
jax: 0.10.0
libtpu: 0.0.40
codegen_flags: <defaults>
</compile_context>

<pallas_src>
import functools

import jax
import jax.numpy as jnp
from jax.experimental import pallas as pl
from jax.experimental.pallas import tpu as pltpu


def _round_up(x, m):
    return (x + m - 1) // m * m


def textcnn2_kernel(emb_ref, wconv_ref, bconv_ref, w1_ref, b1_ref, w2_ref, b2_ref,
                    out_ref, *, window_sizes, num_filters, seq_len):
    """One batch tile.

    emb_ref   : (R, E)        bf16, R = b_tile * seq_len (samples flattened along M)
    wconv_ref : (h_max, E, NF) bf16, fused Conv1d weights (taps zero-padded to h_max)
    bconv_ref : (1, NF)       f32
    w1_ref    : (NF, H)       f32
    b1_ref    : (1, H)        f32
    w2_ref    : (H, C_pad)    f32 (class dim zero-padded to 128 lanes)
    b2_ref    : (1, C_pad)    f32 (-1e30 in padded columns)
    out_ref   : (b_tile, C_pad) f32 softmax probabilities
    """
    R = emb_ref.shape[0]
    h_max = wconv_ref.shape[0]
    NF = wconv_ref.shape[2]
    b_tile = R // seq_len

    emb = emb_ref[...]                                        # (R, E) bf16

    # ---- fused multi-window conv: full-width bf16 matmul per tap, aligned by roll ----
    acc = jnp.dot(emb, wconv_ref[0], preferred_element_type=jnp.float32)
    for k in range(1, h_max):
        y_k = jnp.dot(emb, wconv_ref[k], preferred_element_type=jnp.float32)
        # row r accumulates emb[r+k] @ W[k]; wrapped / cross-sample rows only ever land on
        # positions that are masked out below (taps past a window's length are zero weights).
        acc = acc + pltpu.roll(y_k, shift=R - k, axis=0)

    acc = jnp.maximum(acc + bconv_ref[...], 0.0)              # bias + ReLU, f32

    # ---- per-window valid-length mask + max-pool over the time axis (per sample) ----
    acc3 = acc.reshape(b_tile, seq_len, NF)
    pos = jax.lax.broadcasted_iota(jnp.int32, (b_tile, seq_len, 1), 1)
    col = jax.lax.broadcasted_iota(jnp.int32, (1, 1, NF), 2)
    thresh = jnp.zeros((1, 1, NF), jnp.int32)
    for i, h in enumerate(window_sizes):                      # window i valid: pos <= L - h
        in_win = (col >= i * num_filters) & (col < (i + 1) * num_filters)
        thresh = jnp.where(in_win, seq_len - h, thresh)
    acc3 = jnp.where(pos <= thresh, acc3, 0.0)                # post-ReLU, so 0 is neutral
    pooled = jnp.max(acc3, axis=1)                            # (b_tile, NF)

    # ---- MLP head + softmax ----
    h1 = jnp.maximum(
        jnp.dot(pooled, w1_ref[...], preferred_element_type=jnp.float32) + b1_ref[...],
        0.0)
    logits = jnp.dot(h1, w2_ref[...], preferred_element_type=jnp.float32) + b2_ref[...]

    z = logits - jnp.max(logits, axis=-1, keepdims=True)
    ez = jnp.exp(z)
    denom = jnp.sum(ez, axis=-1, keepdims=True)
    inv = pl.reciprocal(denom, approx=True)                   # EUP slot
    inv = inv * (2.0 - denom * inv)                           # one Newton step -> ~f32 exact
    out_ref[...] = ez * inv


def textcnn2_forward(emb, conv_ws, conv_bs, w1, b1, w2, b2, *, window_sizes, b_tile=256):
    """TextCNN2 forward (post-embedding) as one Pallas kernel over batch tiles.

    emb     : (B, L, E)  gathered embeddings (any float dtype; cast to bf16 here)
    conv_ws : list of (F, E, h_i)  Conv1d weights, PyTorch (out, in, kernel) layout
    conv_bs : list of (F,)
    w1      : (H, NF)    Linear weight, PyTorch (out, in) layout
    b1      : (H,)
    w2      : (C, H)
    b2      : (C,)
    returns : (B, C) float32 softmax probabilities
    """
    B, L, E = emb.shape
    n_win = len(window_sizes)
    F = conv_ws[0].shape[0]
    NF = n_win * F
    H = w1.shape[0]
    C = w2.shape[0]
    h_max = max(window_sizes)

    # ---- fuse the Conv1d weights: (h_max, E, NF) bf16, taps zero-padded per window ----
    parts = []
    for W, h in zip(conv_ws, window_sizes):
        wt = jnp.transpose(jnp.asarray(W), (2, 1, 0)).astype(jnp.bfloat16)   # (h, E, F)
        if h < h_max:
            wt = jnp.concatenate([wt, jnp.zeros((h_max - h, E, F), wt.dtype)], axis=0)
        parts.append(wt)
    wconv = jnp.concatenate(parts, axis=-1)                                   # (h_max, E, NF)
    bconv = jnp.concatenate(
        [jnp.asarray(b, jnp.float32).reshape(1, F) for b in conv_bs], axis=-1)  # (1, NF)

    w1k = jnp.asarray(w1, jnp.float32).T                                      # (NF, H)
    b1k = jnp.asarray(b1, jnp.float32).reshape(1, H)
    # lane-dense output: pad classes to 128; padded logits pushed to -1e30 (softmax -> 0).
    C_pad = _round_up(max(C, 1), 128)
    w2k = jnp.zeros((H, C_pad), jnp.float32).at[:, :C].set(jnp.asarray(w2, jnp.float32).T)
    b2k = jnp.full((1, C_pad), -1e30, jnp.float32).at[:, :C].set(
        jnp.asarray(b2, jnp.float32).reshape(1, C))

    # ---- batch tiling: many samples per grid step, flattened into the M axis ----
    b_tile = max(8, min(int(b_tile), _round_up(B, 8)))
    b_tile = _round_up(b_tile, 8)
    B_pad = _round_up(B, b_tile)
    emb = jnp.asarray(emb, jnp.bfloat16)
    if B_pad != B:
        emb = jnp.concatenate([emb, jnp.zeros((B_pad - B, L, E), emb.dtype)], axis=0)
    emb_flat = emb.reshape(B_pad * L, E)
    rows = b_tile * L

    kernel = functools.partial(textcnn2_kernel, window_sizes=tuple(window_sizes),
                               num_filters=F, seq_len=L)
    out = pl.pallas_call(
        kernel,
        out_shape=jax.ShapeDtypeStruct((B_pad, C_pad), jnp.float32),
        grid=(B_pad // b_tile,),
        in_specs=[
            pl.BlockSpec((rows, E), lambda i: (i, 0)),           # streamed activations
            pl.BlockSpec(wconv.shape, lambda i: (0, 0, 0)),      # grid-invariant weights
            pl.BlockSpec(bconv.shape, lambda i: (0, 0)),
            pl.BlockSpec(w1k.shape, lambda i: (0, 0)),
            pl.BlockSpec(b1k.shape, lambda i: (0, 0)),
            pl.BlockSpec(w2k.shape, lambda i: (0, 0)),
            pl.BlockSpec(b2k.shape, lambda i: (0, 0)),
        ],
        out_specs=pl.BlockSpec((b_tile, C_pad), lambda i: (i, 0)),
        compiler_params=pltpu.CompilerParams(
            dimension_semantics=("parallel",)),                  # batch tiles independent
    )(emb_flat, wconv, bconv, w1k, b1k, w2k, b2k)
    return out[:B, :C]


def reference_forward(emb, conv_ws, conv_bs, w1, b1, w2, b2):
    """Pure-JAX f32 mirror of TextCNN2.forward (post-embedding), for a numerical check."""
    x = jnp.transpose(emb, (0, 2, 1))                            # (B, E, L)
    feats = []
    for W, bv in zip(conv_ws, conv_bs):
        y = jax.lax.conv_general_dilated(
            x, W.astype(jnp.float32), window_strides=(1,), padding="VALID",
            dimension_numbers=("NCH", "OIH", "NCH"),
            precision=jax.lax.Precision.HIGHEST)                 # (B, F, L-h+1)
        y = jnp.maximum(y + bv[None, :, None], 0.0)
        feats.append(jnp.max(y, axis=-1))                        # MaxPool over valid time
    f = jnp.concatenate(feats, axis=1)                           # (B, NF)
    h1 = jnp.maximum(jnp.dot(f, w1.T, precision=jax.lax.Precision.HIGHEST) + b1, 0.0)
    logits = jnp.dot(h1, w2.T, precision=jax.lax.Precision.HIGHEST) + b2
    return jax.nn.softmax(logits, axis=-1)


if __name__ == "__main__":
    # Module hyperparameters (small, consistent with TextCNN2.__init__)
    vocab_size = 50
    embed_size = 32
    num_of_filters = 16
    window_sizes = (2, 3, 4)
    max_len = 16
    num_of_classes = 8
    padding_index = 0
    batch = 14          # deliberately not a multiple of b_tile to exercise batch padding

    key = jax.random.PRNGKey(0)
    keys = jax.random.split(key, 16)

    # Embedding table (padding row zeroed, as nn.Embedding(padding_idx=...) does)
    emb_table = 0.1 * jax.random.normal(keys[0], (vocab_size, embed_size), jnp.float32)
    emb_table = emb_table.at[padding_index].set(0.0)

    # Conv1d weights in PyTorch layout (F, E, h) + biases (F,).  Conv weights are stored
    # in bf16 (the kernel's matmul dtype); the reference uses the same rounded values.
    conv_ws, conv_bs = [], []
    for i, h in enumerate(window_sizes):
        conv_ws.append((0.1 * jax.random.normal(
            keys[1 + i], (num_of_filters, embed_size, h), jnp.float32)).astype(jnp.bfloat16))
        conv_bs.append(0.1 * jax.random.normal(
            keys[4 + i], (num_of_filters,), jnp.float32))

    nf = num_of_filters * len(window_sizes)
    w1 = 0.1 * jax.random.normal(keys[7], (200, nf), jnp.float32)            # (out, in)
    b1 = 0.1 * jax.random.normal(keys[8], (200,), jnp.float32)
    w2 = 0.1 * jax.random.normal(keys[9], (num_of_classes, 200), jnp.float32)
    b2 = 0.1 * jax.random.normal(keys[10], (num_of_classes,), jnp.float32)

    # Integer token input (B, L); include some padding tokens
    tokens = jax.random.randint(keys[11], (batch, max_len), 0, vocab_size)
    tokens = tokens.at[:, -2:].set(padding_index)

    # TODO(synk): the nn.Embedding gather stays in plain JAX (data-dependent HBM gather);
    # activations enter the kernel as bf16 to halve DMA bytes of the dominant stream.
    emb = emb_table[tokens].astype(jnp.bfloat16)                 # (B, L, E)

    out = textcnn2_forward(emb, conv_ws, conv_bs, w1, b1, w2, b2,
                           window_sizes=window_sizes, b_tile=8)  # grid of 2 batch tiles
    out = jax.block_until_ready(out)

    ref = reference_forward(emb.astype(jnp.float32), conv_ws, conv_bs, w1, b1, w2, b2)

    assert out.shape == (batch, num_of_classes), out.shape
    assert bool(jnp.allclose(jnp.sum(out, axis=-1), 1.0, atol=1e-3))
    assert bool(jnp.allclose(out, ref, atol=1e-3, rtol=1e-3)), (out, ref)
    print("KERNEL_OK")
</pallas_src>

<mosaic_0001>
module attributes {stable_mosaic.version = 11 : i64} {
  func.func @textcnn2_kernel(%arg0: i32, %arg1: memref<128x32xbf16, #tpu.memory_space<vmem>>, %arg2: memref<4x32x48xbf16, #tpu.memory_space<vmem>>, %arg3: memref<1x48xf32, #tpu.memory_space<vmem>>, %arg4: memref<48x200xf32, #tpu.memory_space<vmem>>, %arg5: memref<1x200xf32, #tpu.memory_space<vmem>>, %arg6: memref<200x128xf32, #tpu.memory_space<vmem>>, %arg7: memref<1x128xf32, #tpu.memory_space<vmem>>, %arg8: memref<8x128xf32, #tpu.memory_space<vmem>>) attributes {dimension_semantics = [#tpu.dimension_semantics<parallel>], iteration_bounds = array<i64: 2>, scalar_prefetch = 0 : i64, scratch_operands = 0 : i64, tpu.core_type = #tpu.core_type<tc>, window_params = [{transform_indices = @transform_0, window_bounds = array<i64: 128, 32>}, {pipeline_mode = #tpu.pipeline_mode<synchronous>, transform_indices = @transform_1, window_bounds = array<i64: 4, 32, 48>}, {pipeline_mode = #tpu.pipeline_mode<synchronous>, transform_indices = @transform_2, window_bounds = array<i64: 1, 48>}, {pipeline_mode = #tpu.pipeline_mode<synchronous>, transform_indices = @transform_3, window_bounds = array<i64: 48, 200>}, {pipeline_mode = #tpu.pipeline_mode<synchronous>, transform_indices = @transform_4, window_bounds = array<i64: 1, 200>}, {pipeline_mode = #tpu.pipeline_mode<synchronous>, transform_indices = @transform_5, window_bounds = array<i64: 200, 128>}, {pipeline_mode = #tpu.pipeline_mode<synchronous>, transform_indices = @transform_6, window_bounds = array<i64: 1, 128>}, {transform_indices = @transform_7, window_bounds = array<i64: 8, 128>}]} {
    %c0 = arith.constant 0 : index
    %c0_0 = arith.constant 0 : index
    %0 = vector.load %arg1[%c0, %c0_0] : memref<128x32xbf16, #tpu.memory_space<vmem>>, vector<128x32xbf16>
    %c0_1 = arith.constant 0 : index
    %c0_2 = arith.constant 0 : index
    %c0_3 = arith.constant 0 : index
    %1 = vector.load %arg2[%c0_1, %c0_2, %c0_3] : memref<4x32x48xbf16, #tpu.memory_space<vmem>>, vector<1x32x48xbf16>
    %2 = vector.shape_cast %1 : vector<1x32x48xbf16> to vector<32x48xbf16>
    %cst = arith.constant dense<0.000000e+00> : vector<128x48xf32>
    %3 = tpu.matmul %0, %2, %cst {dimension_numbers = #tpu.dot_dimension_numbers<[1], [0], [0], [1], [0, 0, 1, 1], [], []>} : vector<128x32xbf16>, vector<32x48xbf16>, vector<128x48xf32> -> vector<128x48xf32>
    %c1 = arith.constant 1 : index
    %c0_4 = arith.constant 0 : index
    %c0_5 = arith.constant 0 : index
    %4 = vector.load %arg2[%c1, %c0_4, %c0_5] : memref<4x32x48xbf16, #tpu.memory_space<vmem>>, vector<1x32x48xbf16>
    %5 = vector.shape_cast %4 : vector<1x32x48xbf16> to vector<32x48xbf16>
    %cst_6 = arith.constant dense<0.000000e+00> : vector<128x48xf32>
    %6 = tpu.matmul %0, %5, %cst_6 {dimension_numbers = #tpu.dot_dimension_numbers<[1], [0], [0], [1], [0, 0, 1, 1], [], []>} : vector<128x32xbf16>, vector<32x48xbf16>, vector<128x48xf32> -> vector<128x48xf32>
    %c127_i32 = arith.constant 127 : i32
    %7 = tpu.dynamic_rotate %6 by %c127_i32 dim 0 : vector<128x48xf32>, i32 -> vector<128x48xf32>
    %8 = arith.addf %3, %7 : vector<128x48xf32>
    %c2 = arith.constant 2 : index
    %c0_7 = arith.constant 0 : index
    %c0_8 = arith.constant 0 : index
    %9 = vector.load %arg2[%c2, %c0_7, %c0_8] : memref<4x32x48xbf16, #tpu.memory_space<vmem>>, vector<1x32x48xbf16>
    %10 = vector.shape_cast %9 : vector<1x32x48xbf16> to vector<32x48xbf16>
    %cst_9 = arith.constant dense<0.000000e+00> : vector<128x48xf32>
    %11 = tpu.matmul %0, %10, %cst_9 {dimension_numbers = #tpu.dot_dimension_numbers<[1], [0], [0], [1], [0, 0, 1, 1], [], []>} : vector<128x32xbf16>, vector<32x48xbf16>, vector<128x48xf32> -> vector<128x48xf32>
    %c126_i32 = arith.constant 126 : i32
    %12 = tpu.dynamic_rotate %11 by %c126_i32 dim 0 : vector<128x48xf32>, i32 -> vector<128x48xf32>
    %13 = arith.addf %8, %12 : vector<128x48xf32>
    %c3 = arith.constant 3 : index
    %c0_10 = arith.constant 0 : index
    %c0_11 = arith.constant 0 : index
    %14 = vector.load %arg2[%c3, %c0_10, %c0_11] : memref<4x32x48xbf16, #tpu.memory_space<vmem>>, vector<1x32x48xbf16>
    %15 = vector.shape_cast %14 : vector<1x32x48xbf16> to vector<32x48xbf16>
    %cst_12 = arith.constant dense<0.000000e+00> : vector<128x48xf32>
    %16 = tpu.matmul %0, %15, %cst_12 {dimension_numbers = #tpu.dot_dimension_numbers<[1], [0], [0], [1], [0, 0, 1, 1], [], []>} : vector<128x32xbf16>, vector<32x48xbf16>, vector<128x48xf32> -> vector<128x48xf32>
    %c125_i32 = arith.constant 125 : i32
    %17 = tpu.dynamic_rotate %16 by %c125_i32 dim 0 : vector<128x48xf32>, i32 -> vector<128x48xf32>
    %18 = arith.addf %13, %17 : vector<128x48xf32>
    %c0_13 = arith.constant 0 : index
    %c0_14 = arith.constant 0 : index
    %19 = vector.load %arg3[%c0_13, %c0_14] : memref<1x48xf32, #tpu.memory_space<vmem>>, vector<1x48xf32>
    %20 = vector.broadcast %19 : vector<1x48xf32> to vector<128x48xf32>
    %21 = arith.addf %18, %20 : vector<128x48xf32>
    %cst_15 = arith.constant 0.000000e+00 : f32
    %22 = vector.broadcast %cst_15 : f32 to vector<128x48xf32>
    %23 = arith.maximumf %21, %22 : vector<128x48xf32>
    %24 = vector.shape_cast %23 : vector<128x48xf32> to vector<8x16x48xf32>
    %25 = tpu.iota {dimensions = array<i32: 1>} : vector<8x16x1xi32>
    %26 = tpu.iota {dimensions = array<i32: 2>} : vector<1x1x48xi32>
    %c0_i32 = arith.constant 0 : i32
    %27 = vector.broadcast %c0_i32 : i32 to vector<1x1x48xi32>
    %c0_i32_16 = arith.constant 0 : i32
    %28 = vector.broadcast %c0_i32_16 : i32 to vector<1x1x48xi32>
    %29 = arith.cmpi sge, %26, %28 : vector<1x1x48xi32>
    %c16_i32 = arith.constant 16 : i32
    %30 = vector.broadcast %c16_i32 : i32 to vector<1x1x48xi32>
    %31 = arith.cmpi slt, %26, %30 : vector<1x1x48xi32>
    %32 = arith.andi %29, %31 : vector<1x1x48xi1>
    %c14_i32 = arith.constant 14 : i32
    %33 = vector.broadcast %c14_i32 : i32 to vector<1x1x48xi32>
    %34 = arith.select %32, %33, %27 : vector<1x1x48xi1>, vector<1x1x48xi32>
    %c16_i32_17 = arith.constant 16 : i32
    %35 = vector.broadcast %c16_i32_17 : i32 to vector<1x1x48xi32>
    %36 = arith.cmpi sge, %26, %35 : vector<1x1x48xi32>
    %c32_i32 = arith.constant 32 : i32
    %37 = vector.broadcast %c32_i32 : i32 to vector<1x1x48xi32>
    %38 = arith.cmpi slt, %26, %37 : vector<1x1x48xi32>
    %39 = arith.andi %36, %38 : vector<1x1x48xi1>
    %c13_i32 = arith.constant 13 : i32
    %40 = vector.broadcast %c13_i32 : i32 to vector<1x1x48xi32>
    %41 = arith.select %39, %40, %34 : vector<1x1x48xi1>, vector<1x1x48xi32>
    %c32_i32_18 = arith.constant 32 : i32
    %42 = vector.broadcast %c32_i32_18 : i32 to vector<1x1x48xi32>
    %43 = arith.cmpi sge, %26, %42 : vector<1x1x48xi32>
    %c48_i32 = arith.constant 48 : i32
    %44 = vector.broadcast %c48_i32 : i32 to vector<1x1x48xi32>
    %45 = arith.cmpi slt, %26, %44 : vector<1x1x48xi32>
    %46 = arith.andi %43, %45 : vector<1x1x48xi1>
    %c12_i32 = arith.constant 12 : i32
    %47 = vector.broadcast %c12_i32 : i32 to vector<1x1x48xi32>
    %48 = arith.select %46, %47, %41 : vector<1x1x48xi1>, vector<1x1x48xi32>
    %49 = vector.broadcast %25 : vector<8x16x1xi32> to vector<8x16x48xi32>
    %50 = vector.broadcast %48 : vector<1x1x48xi32> to vector<8x16x48xi32>
    %51 = arith.cmpi sle, %49, %50 : vector<8x16x48xi32>
    %cst_19 = arith.constant 0.000000e+00 : f32
    %52 = vector.broadcast %cst_19 : f32 to vector<8x16x48xf32>
    %53 = arith.select %51, %24, %52 : vector<8x16x48xi1>, vector<8x16x48xf32>
    %cst_20 = arith.constant dense<0xFF800000> : vector<8x48xf32>
    %54 = vector.multi_reduction <maximumf>, %53, %cst_20 [1] : vector<8x16x48xf32> to vector<8x48xf32>
    %c0_21 = arith.constant 0 : index
    %c0_22 = arith.constant 0 : index
    %55 = vector.load %arg4[%c0_21, %c0_22] : memref<48x200xf32, #tpu.memory_space<vmem>>, vector<48x200xf32>
    %cst_23 = arith.constant dense<0.000000e+00> : vector<8x200xf32>
    %56 = tpu.matmul %54, %55, %cst_23 {dimension_numbers = #tpu.dot_dimension_numbers<[1], [0], [0], [1], [0, 0, 1, 1], [], []>} : vector<8x48xf32>, vector<48x200xf32>, vector<8x200xf32> -> vector<8x200xf32>
    %c0_24 = arith.constant 0 : index
    %c0_25 = arith.constant 0 : index
    %57 = vector.load %arg5[%c0_24, %c0_25] : memref<1x200xf32, #tpu.memory_space<vmem>>, vector<1x200xf32>
    %58 = vector.broadcast %57 : vector<1x200xf32> to vector<8x200xf32>
    %59 = arith.addf %56, %58 : vector<8x200xf32>
    %cst_26 = arith.constant 0.000000e+00 : f32
    %60 = vector.broadcast %cst_26 : f32 to vector<8x200xf32>
    %61 = arith.maximumf %59, %60 : vector<8x200xf32>
    %c0_27 = arith.constant 0 : index
    %c0_28 = arith.constant 0 : index
    %62 = vector.load %arg6[%c0_27, %c0_28] : memref<200x128xf32, #tpu.memory_space<vmem>>, vector<200x128xf32>
    %cst_29 = arith.constant dense<0.000000e+00> : vector<8x128xf32>
    %63 = tpu.matmul %61, %62, %cst_29 {dimension_numbers = #tpu.dot_dimension_numbers<[1], [0], [0], [1], [0, 0, 1, 1], [], []>} : vector<8x200xf32>, vector<200x128xf32>, vector<8x128xf32> -> vector<8x128xf32>
    %c0_30 = arith.constant 0 : index
    %c0_31 = arith.constant 0 : index
    %64 = vector.load %arg7[%c0_30, %c0_31] : memref<1x128xf32, #tpu.memory_space<vmem>>, vector<1x128xf32>
    %65 = vector.broadcast %64 : vector<1x128xf32> to vector<8x128xf32>
    %66 = arith.addf %63, %65 : vector<8x128xf32>
    %cst_32 = arith.constant dense<0xFF800000> : vector<8xf32>
    %67 = vector.multi_reduction <maximumf>, %66, %cst_32 [1] : vector<8x128xf32> to vector<8xf32>
    %68 = vector.shape_cast %67 : vector<8xf32> to vector<8x1xf32>
    %69 = vector.broadcast %68 : vector<8x1xf32> to vector<8x128xf32>
    %70 = arith.subf %66, %69 : vector<8x128xf32>
    %71 = math.exp %70 : vector<8x128xf32>
    %cst_33 = arith.constant dense<0.000000e+00> : vector<8xf32>
    %72 = vector.multi_reduction <add>, %71, %cst_33 [1] : vector<8x128xf32> to vector<8xf32>
    %73 = vector.shape_cast %72 : vector<8xf32> to vector<8x1xf32>
    %74 = tpu.reciprocal %73 {approx = true} : vector<8x1xf32> -> vector<8x1xf32>
    %75 = arith.mulf %73, %74 : vector<8x1xf32>
    %cst_34 = arith.constant 2.000000e+00 : f32
    %76 = vector.broadcast %cst_34 : f32 to vector<8x1xf32>
    %77 = arith.subf %76, %75 : vector<8x1xf32>
    %78 = arith.mulf %74, %77 : vector<8x1xf32>
    %79 = vector.broadcast %78 : vector<8x1xf32> to vector<8x128xf32>
    %80 = arith.mulf %71, %79 : vector<8x128xf32>
    %c0_35 = arith.constant 0 : index
    %c0_36 = arith.constant 0 : index
    %81 = vector.load %arg8[%c0_35, %c0_36] : memref<8x128xf32, #tpu.memory_space<vmem>>, vector<8x128xf32>
    tpu.vector_store %arg8[%c0_35, %c0_36], %80 {strides = array<i32>} : memref<8x128xf32, #tpu.memory_space<vmem>>, vector<8x128xf32>,
    return
  }
  func.func @transform_0(%arg0: i32) -> (i32, i32) {
    %c0_i32 = arith.constant 0 : i32
    %c0_i32_0 = arith.constant 0 : i32
    return %arg0, %c0_i32 : i32, i32
  }
  func.func @transform_1(%arg0: i32) -> (i32, i32, i32) {
    %c0_i32 = arith.constant 0 : i32
    %c0_i32_0 = arith.constant 0 : i32
    %c0_i32_1 = arith.constant 0 : i32
    %c0_i32_2 = arith.constant 0 : i32
    return %c0_i32, %c0_i32_0, %c0_i32_1 : i32, i32, i32
  }
  func.func @transform_2(%arg0: i32) -> (i32, i32) {
    %c0_i32 = arith.constant 0 : i32
    %c0_i32_0 = arith.constant 0 : i32
    %c0_i32_1 = arith.constant 0 : i32
    return %c0_i32, %c0_i32_0 : i32, i32
  }
  func.func @transform_3(%arg0: i32) -> (i32, i32) {
    %c0_i32 = arith.constant 0 : i32
    %c0_i32_0 = arith.constant 0 : i32
    %c0_i32_1 = arith.constant 0 : i32
    return %c0_i32, %c0_i32_0 : i32, i32
  }
  func.func @transform_4(%arg0: i32) -> (i32, i32) {
    %c0_i32 = arith.constant 0 : i32
    %c0_i32_0 = arith.constant 0 : i32
    %c0_i32_1 = arith.constant 0 : i32
    return %c0_i32, %c0_i32_0 : i32, i32
  }
  func.func @transform_5(%arg0: i32) -> (i32, i32) {
    %c0_i32 = arith.constant 0 : i32
    %c0_i32_0 = arith.constant 0 : i32
    %c0_i32_1 = arith.constant 0 : i32
    return %c0_i32, %c0_i32_0 : i32, i32
  }
  func.func @transform_6(%arg0: i32) -> (i32, i32) {
    %c0_i32 = arith.constant 0 : i32
    %c0_i32_0 = arith.constant 0 : i32
    %c0_i32_1 = arith.constant 0 : i32
    return %c0_i32, %c0_i32_0 : i32, i32
  }
  func.func @transform_7(%arg0: i32) -> (i32, i32) {
    %c0_i32 = arith.constant 0 : i32
    %c0_i32_0 = arith.constant 0 : i32
    return %arg0, %c0_i32 : i32, i32
  }
}

</mosaic_0001>

<bundles_post_ra>
// kernel: tpu_custom_call.1
= control target key start
LH: loop header
LB: loop body
LE: loop exit
PB: predicated region body
PF: predicated region fallthrough
CT: control target
= control target key end

     0   :  { %12 = vsyncpa [#allocation3], 0  ;;  %s2497_s0 = inlined_call_operand.vmem [shape: bf16[256,32], index: 0, kind: input, shape index: {}]   ;;  %s2498_s1 = inlined_call_operand.vmem [shape: bf16[4,32,48], index: 1, kind: input, shape index: {}]   ;;  %s2499_s2 = inlined_call_operand.vmem [shape: f32[1,48], index: 2, kind: input, shape index: {}]   ;;  %s2500_s3 = inlined_call_operand.vmem [shape: f32[48,200], index: 3, kind: input, shape index: {}]   ;;  %s2501_s4 = inlined_call_operand.vmem [shape: f32[1,200], index: 4, kind: input, shape index: {}]   ;;  %s2502_s5 = inlined_call_operand.hbm [shape: f32[200,128], index: 5, kind: input, shape index: {}]   ;;  %s2503_s6 = inlined_call_operand.vmem [shape: f32[1,128], index: 6, kind: input, shape index: {}]   ;;  %s2504_s7 = inlined_call_operand.hbm [shape: f32[16,128], index: 7, kind: output, shape index: {}]  }
   0x1   :  { %13 = vsyncpa [#allocation4], 0 }
   0x2   :  { %15 = vsyncpa [#allocation4 + $0x1], 0  ;;  %s1901_s24 = smov 0   ;;  %s1903_s25 = smov 0  }
   0x3   :  { %s1905_s26 = smov 0   ;;  %s1907_s27 = smov 0  }
   0x4 LB: > { %s1922_s28 = sadd.s32 4294967295, %s1852_s27   ;;  %s1434_s29 = sadd.s32 4294967294, %s1852_s27   ;;  %s1852_s27 = sphi %s1907_s27, %s2526_s27   ;;  %s1848_s26 = sphi %s1905_s26, %s2525_s26   ;;  %s1844_s25 = sphi %s1903_s25, %s2524_s25   ;;  %s1840_s24 = sphi %s1901_s24, %s2523_s24  }
   0x5   : > { %s1926_s30 = sadd.s32 1, %s1852_s27   ;;  %s180_s8 = sadd.s32 1, %s1848_s26 }
   0x6   : > { %s177_s9 = ssub.s32 %s1852_s27, %s1926_s30  ;;  %p190_p0 = scmp.ne.s32.totalorder %s1848_s26, %s1844_s25 }
   0x7   : > { %p178_p1 = scmp.eq.s32.totalorder %s177_s9, 0  ;;  %p191_p2 = scmp.eq.s32.totalorder %s1922_s28, 1 }
   0x8   : > { %p196_p3 = scmp.ne.s32.totalorder %s1844_s25, %s1840_s24  ;;  %p197_p4 = scmp.eq.s32.totalorder %s1434_s29, 1 }
   0x9   : > { %s1937_s10 = scalar_select %p178_p1, %s1848_s26, %s180_s8  }
   0xa   : > { %p1939_p5 = por %p191_p2, %p190_p0  ;;  %p1943_p6 = por %p197_p4, %p196_p3 }
   0xb   : > { %p1435_p7 = scmp.ge.s32.totalorder %s1852_s27, 1  ;;  %p204_p8 = scmp.lt.s32.totalorder %s1852_s27, 3 }
   0xc   : > { %s2508_s11 = scalar_select %p1939_p5, 1, 0 }
   0xd   : > { %s2509_s12 = scalar_select %p1943_p6, 1, 0 }
   0xe   : > { %p2505_p9 = scmp.eq.s32.totalorder %s1922_s28, 0  ;;  %p1950_p10 = pnand %p1435_p7, %p204_p8 }
   0xf   : > { %s1854_s14 = smov [#allocation2]   ;;  %s1758_s19 = scalar_lea.hbm %s2502_s5, 3200 }
  0x10   : > { %s2510_s13 = scalar_select %p1950_p10, 1, 0 }
  0x11   : > { %s228_s15 = sshll.u32 %s1854_s14, 4  ;;  %p1689_p11 = pneg %p1950_p10  ;;  %s229_s15 = int_to_ptr.vmem [resolvable:$true] %s228_s15 }
  0x12   : > { %p1759_p13 = scmp.ne.s32.totalorder %s2502_s5, %s1758_s19  ;;  %p1765_p3 = scmp.lt.u32.totalorder %s1758_s19, %s2502_s5 }
  0x13   : > { %p1958_p12 = pnand %p2505_p9, %p1689_p11 }
  0x15   : > { %p1760_p0 = pneg %p1958_p12 }
  0x17   : > { %p1761_p1 = pnand %p1760_p0, %p1759_p13 }
  0x19   : > { %p1762_p2 = pneg %p1761_p1 }
  0x1b   : > { %p1767_p4 = pnand %p1765_p3, %p1762_p2 }
  0x1d   : > { %1770 = shalt.err (!%p1767_p4)
}
  0x1e   : > { %s1771_s29 = scalar_lea.vmem %s229_s15, 3200  ;;  %p1779_p9 = scmp.lt.s32.totalorder %s229_s15, %s229_s15 }
  0x1f   : > { %p1772_p7 = scmp.ne.s32.totalorder %s229_s15, %s1771_s29  ;;  %p1780_p6 = scmp.lt.s32.totalorder %s1771_s29, %s1771_s29 }
  0x21   : > { %p1774_p8 = pnand %p1772_p7, %p1760_p0  ;;  %p1781_p5 = por %p1780_p6, %p1779_p9 }
  0x23   : > { %p1775_p11 = pneg %p1774_p8 }
  0x25   : > { %p1782_p10 = pnand %p1781_p5, %p1775_p11 }
  0x27   : > { %1785 = shalt.err (!%p1782_p10)
}
  0x28   : > { %s1855_s8 = smov 128   ;;  %s1856_s9 = smov 8  }
  0x29   : > { %1692 = dma.hbm_to_vmem [thread:$0]  (!%p1958_p12), %s2502_s5, 3200, %s229_s15, [#allocation3], %s1855_s8, %s1855_s8, %s1856_s9  }
  0x2a   : > { %p2512_p13 = scmp.ne.s32.totalorder %s2510_s13, 0 }
  0x2b   : > { %p2513_p1 = scmp.eq.s32.totalorder (!%p2512_p13), %s1922_s28, 0 }
  0x2c   : > { %256 = sbr.rel (%p2512_p13) target bundleno = 1146 (0x47a), region = 48 }
  0x33   : > { %1831 = dma.done.wait (%p2513_p1), [#allocation3], 3200   ;;  %p2514_p0 = pmov %p2513_p1 }
  0x34   : > { %s1441_s18 = sshll.u32 %s1922_s28, 4  ;;  %v1738_v0 = vld [vmem:[%s2498_s1 + $0x10] sm:$0xff]   ;;  %v1739_v1 = vld [vmem:[%s2498_s1] sm:$0xff]   ;;  %v1740_v2 = vld [vmem:[%s2498_s1 + $0x18] sm:$0xff]   ;;  %vm372_vm0 = vcmask 261120   ;;  %v1857_v32 = vmov 0.0   ;;  %v510_v48 = vlaneseq }
  0x35   : > { %1833 = vsyncadd (%p2514_p0), [#allocation3], 4294964096  ;;  %p289_p5 = scmp.lt.s32.totalorder %s1441_s18, 31  ;;  %1551 = vmatprep.subr.bf16.mxu0 %v1738_v0  ;;  %1679 = vmatprep.subr.bf16.mxu1 %v1739_v1  ;;  %v1741_v3 = vld [vmem:[%s2498_s1 + $0x8] sm:$0xff]   ;;  %v1750_v9 = vld [vmem:[%s2498_s1 + $0x30] sm:$0xff]   ;;  %v1858_v38 = vmov 0.0|0.0  }
  0x36   : > { %1552 = vmatpush3.bf16.msra.mxu0 %v1738_v0  ;;  %1681 = vmatpush3.bf16.msra.mxu1 %v1739_v1  ;;  %v1751_v10 = vld [vmem:[%s2498_s1 + $0x38] sm:$0xff]   ;;  %v1752_v11 = vld [vmem:[%s2498_s1 + $0x20] sm:$0xff]   ;;  %v1753_v15 = vld [vmem:[%s2498_s1 + $0x28] sm:$0xff]   ;;  %v2096_v52 = vshrl.u32 %v510_v48, 7  ;;  %vm1036_vm12 = vcmask 392192   ;;  %vm1141_vm14 = vcmask 1041409  }
  0x37   : > { %s2528_s18 = smov (!%p289_p5, %s1441_s18), 31  ;;  %1553 = vmatprep.subr.bf16.mxu0 %v1740_v2  ;;  %1680 = vmatprep.subr.bf16.mxu1 %v1741_v3  ;;  %v1110_v16 = vld [vmem:[%s2500_s3 + $0x8] sm:$0xff]  ;;  %v1112_v17 = vld [vmem:[%s2500_s3 + $0x18] sm:$0xff]  ;;  %v1109_v19 = vld [vmem:[%s2500_s3] sm:$0xff]  ;;  %vm1143_vm15 = vcmask 1042434   ;;  %s285_s29 = sand.u32 1, %s1844_s25  }
  0x38   : > { %s1442_s19 = sshll.u32 %s2528_s18, 2  ;;  %v1631_v18 = vpack.c.bf16 %v1112_v17, %v1110_v16  ;;  %v1111_v20 = vld [vmem:[%s2500_s3 + $0x10] sm:$0xff]  ;;  %v1114_v22 = vld [vmem:[%s2500_s3 + $0x28] sm:$0xff]  ;;  %v1116_v23 = vld [vmem:[%s2500_s3 + $0x38] sm:$0xff]  ;;  %vm512_vm1 = vcmp.lt.s32.totalorder %v2096_v52, 7  ;;  %vm931_vm2 = vcmp.lt.s32.totalorder %v2096_v52, 5 }
  0x39   : > { %s1994_s23 = scalar_lea.vmem %s2497_s0, %s1442_s19  ;;  %v1633_v21 = vpack.c.bf16 %v1111_v20, %v1109_v19  ;;  %v1635_v24 = vpack.c.bf16 %v1116_v23, %v1114_v22  ;;  %v1113_v25 = vld [vmem:[%s2500_s3 + $0x20] sm:$0xff]  ;;  %v1115_v26 = vld [vmem:[%s2500_s3 + $0x30] sm:$0xff]  ;;  %v1118_v27 = vld [vmem:[%s2500_s3 + $0x48] sm:$0xff]  ;;  %vm768_vm10 = vcmp.lt.s32.totalorder %v2096_v52, 6  ;;  %s1440_s8 = sshll.u32 %s285_s29, 3 }
  0x3a   : > { %v1742_v4 = vld [vmem:[%s1994_s23] sm:$0xff]   ;;  %v1743_v5 = vld [vmem:[%s1994_s23 + $0x10] sm:$0xff]   ;;  %v1744_v6 = vld [vmem:[%s1994_s23 + $0x8] sm:$0xff]   ;;  %1554 = vmatpush3.bf16.msra.mxu0 %v1740_v2  ;;  %1682 = vmatpush3.bf16.msra.mxu1 %v1741_v3  ;;  %v1637_v28 = vpack.c.bf16 %v1115_v26, %v1113_v25  ;;  %s1508_s9 = sshll.u32 %s1922_s28, 7  ;;  %s287_s14 = scalar_lea.vmem [#allocation5], %s1440_s8 }
  0x3b   : > { %1555 = vmatprep.mubr.msk.bf16.mxu0 %vm372_vm0, %v1742_v4  ;;  %1579 = vmatprep.mubr.msk.bf16.mxu1 %vm372_vm0, %v1743_v5  ;;  %v1745_v7 = vld [vmem:[%s1994_s23 + $0x18] sm:$0xff]   ;;  %v1746_v8 = vld [vmem:[%s1994_s23 + $0x20] sm:$0xff]   ;;  %v1747_v12 = vld [vmem:[%s1994_s23 + $0x28] sm:$0xff]   ;;  %s1363_s17 = sshll.u32 %s287_s14, 4  ;;  %s2455_s20 = scalar_lea.hbm %s2504_s7, %s1508_s9  ;;  %s2457_s17 = int_to_ptr.vmem [resolvable:$true] %s1363_s17 }
  0x3c   : > { %1571 = vmatprep.subr.bf16.mxu0 %v1739_v1  ;;  %1611 = vmatprep.subr.bf16.mxu1 %v1750_v9  ;;  %v1748_v13 = vld [vmem:[%s1994_s23 + $0x30] sm:$0xff]   ;;  %v1749_v14 = vld [vmem:[%s1994_s23 + $0x38] sm:$0xff]   ;;  %v1117_v30 = vld [vmem:[%s2500_s3 + $0x40] sm:$0xff]  ;;  %s1350_s16 = scalar_lea.sflag [#allocation4], %s285_s29  ;;  %s1786_s21 = scalar_lea.vmem %s2457_s17, 128 }
  0x3d   : > { %1556 = vmatmul.mubr.msk.bf16.vlgmr.msra.gmra.mrb[0].mxu0 %vm372_vm0, %v1744_v6  ;;  %1580 = vmatmul.mubr.msk.bf16.vlgmr.msra.gmra.mrb[0].mxu1 %vm372_vm0, %v1745_v7  ;;  %v1120_v29 = vld [vmem:[%s2500_s3 + $0x58] sm:$0xff]  ;;  %v1119_v31 = vld [vmem:[%s2500_s3 + $0x50] sm:$0xff]  ;;  %v1230_v35 = vld [vmem:[#allocation2] sm:$0xff]  ;;  %p1787_p6 = scmp.ne.s32.totalorder %s2457_s17, %s1786_s21  ;;  %p2521_p9 = scmp.ne.s32.totalorder %s2508_s11, 0 }
  0x3e   : > { %1572 = vmatpush3.bf16.msra.mxu0 %v1739_v1  ;;  %1559 = vmatprep.mubr.msk.bf16.mxu0 %vm372_vm0, %v1743_v5  ;;  %v1639_v33 = vpack.c.bf16 %v1120_v29, %v1118_v27  ;;  %v1641_v34 = vpack.c.bf16 %v1119_v31, %v1117_v30  ;;  %v1231_v36 = vld [vmem:[#allocation2 + $0x8] sm:$0xff]  ;;  %v1232_v37 = vld [vmem:[#allocation2 + $0x10] sm:$0xff]  ;;  %v1233_v40 = vld [vmem:[#allocation2 + $0x18] sm:$0xff]  ;;  %s1860_s28 = smov [#allocation5]  }
  0x3f   : > { %1583 = vmatprep.mubr.msk.bf16.mxu1 %vm372_vm0, %v1746_v8  ;;  %1573 = vmatprep.subr.bf16.mxu0 %v1741_v3  ;;  %v1644_v39 = vpack.c.bf16 %v1231_v36, %v1230_v35  ;;  %v1647_v41 = vpack.c.bf16 %v1233_v40, %v1232_v37  ;;  %v1234_v42 = vld [vmem:[#allocation2 + $0x20] sm:$0xff]  ;;  %v1235_v43 = vld [vmem:[#allocation2 + $0x28] sm:$0xff]  ;;  %v1236_v45 = vld [vmem:[#allocation2 + $0x30] sm:$0xff]  ;;  %p1788_p10 = pnand %p1787_p6, %p2521_p9  ;;  %s1790_s15 = sshll.u32 %s1860_s28, 4  ;;  %s1791_s15 = int_to_ptr.vmem [resolvable:$false] %s1790_s15 }
  0x40   : > { %1612 = vmatpush3.bf16.msra.mxu1 %v1750_v9  ;;  %v1650_v44 = vpack.c.bf16 %v1235_v43, %v1234_v42  ;;  %v1237_v46 = vld [vmem:[#allocation2 + $0x38] sm:$0xff]  ;;  %v1238_v49 = vld [vmem:[#allocation2 + $0x40] sm:$0xff]  ;;  %v1239_v50 = vld [vmem:[#allocation2 + $0x48] sm:$0xff]  ;;  %s1792_s13 = scalar_lea.vmem %s1791_s15, 256  ;;  %p1793_p2 = scmp.lt.s32.totalorder %s2457_s17, %s1791_s15 }
  0x41   : > { %1613 = vmatprep.subr.bf16.mxu1 %v1751_v10  ;;  %v1653_v47 = vpack.c.bf16 %v1237_v46, %v1236_v45  ;;  %v1656_v51 = vpack.c.bf16 %v1239_v50, %v1238_v49  ;;  %v1240_v53 = vld [vmem:[#allocation2 + $0x50] sm:$0xff]  ;;  %v1241_v54 = vld [vmem:[#allocation2 + $0x58] sm:$0xff]  ;;  %v1242_v61 = vld [vmem:[#allocation2 + $0x60] sm:$0xff]  ;;  %p1789_p12 = pneg %p1788_p10  ;;  %p1794_p3 = scmp.lt.s32.totalorder %s1792_s13, %s1786_s21 }
  0x42   : > { %1574 = vmatpush3.bf16.msra.mxu0 %v1741_v3  ;;  %v1659_v58 = vpack.c.bf16 %v1241_v54, %v1240_v53  ;;  %v1243_v62 = vld [vmem:[#allocation2 + $0x68] sm:$0xff]  ;;  %v1246_v19 = vld [vmem:[#allocation2 + $0x80] sm:$0xff]  ;;  %v1249_v35 = vld [vmem:[#allocation2 + $0x98] sm:$0xff] }
  0x43   : > { %1591 = vmatprep.subr.bf16.mxu0 %v1752_v11  ;;  %v1247_v20 = vld [vmem:[#allocation2 + $0x88] sm:$0xff]  ;;  %v1250_v46 = vld [vmem:[#allocation2 + $0xa0] sm:$0xff]  ;;  %p1795_p4 = por %p1794_p3, %p1793_p2 }
  0x44   : > { %1614 = vmatpush3.bf16.msra.mxu1 %v1751_v10  ;;  %v1244_v10 = vld [vmem:[#allocation2 + $0x70] sm:$0xff]  ;;  %v1668_v29 = vpack.c.bf16 %v1247_v20, %v1246_v19 }
  0x45   : > { %1560 = vmatmul.mubr.msk.bf16.gmra.mrb[4].mxu0 %vm372_vm0, %v1745_v7  ;;  %1584 = vmatmul.mubr.msk.bf16.gmra.mrb[4].mxu1 %vm372_vm0, %v1747_v12  ;;  %p1796_p7 = pnand %p1795_p4, %p1789_p12 }
  0x46   : > { %1563 = vmatprep.mubr.msk.bf16.mxu0 %vm372_vm0, %v1746_v8  ;;  %1587 = vmatprep.mubr.msk.bf16.mxu1 %vm372_vm0, %v1748_v13 }
  0x47   : > { %1643 = vmatprep.subr.bf16.mxu1 %v1858_v38 }
  0x4d   : > { %1564 = vmatmul.mubr.msk.bf16.gmra.mrb[8].mxu0 %vm372_vm0, %v1747_v12  ;;  %1588 = vmatmul.mubr.msk.bf16.gmra.mrb[8].mxu1 %vm372_vm0, %v1749_v14 }
  0x4e   : > { %1567 = vmatprep.mubr.msk.bf16.mxu0 %vm372_vm0, %v1748_v13  ;;  %1615 = vmatprep.mubr.msk.bf16.mxu1 %vm372_vm0, %v1742_v4 }
  0x55   : > { %1568 = vmatmul.mubr.msk.bf16.gmra.mrb[12].mxu0 %vm372_vm0, %v1749_v14  ;;  %1616 = vmatmul.mubr.msk.bf16.vlgmr.msra.gmra.mrb[12].mxu1 %vm372_vm0, %v1744_v6 }
  0x56   : > { %1575 = vmatprep.mubr.msk.bf16.mxu0 %vm372_vm0, %v1742_v4  ;;  %1619 = vmatprep.mubr.msk.bf16.mxu1 %vm372_vm0, %v1743_v5 }
  0x57   : > { %1645 = vmatpush1.bf16.msra.mxu1 %v1644_v39 }
  0x58   : > { %1646 = vmatprep.subr.bf16.mxu1 %v1858_v38 }
  0x5b   : > { %1648 = vmatpush1.bf16.msra.mxu1 %v1647_v41 }
  0x5c   : > { %1649 = vmatprep.subr.bf16.mxu1 %v1858_v38 }
  0x5d   : > { %1576 = vmatmul.mubr.msk.bf16.vlgmr.msra.gmra.mrb[16].mxu0 %vm372_vm0, %v1744_v6  ;;  %1620 = vmatmul.mubr.msk.bf16.gmra.mrb[16].mxu1 %vm372_vm0, %v1745_v7 }
  0x5e   : > { %1592 = vmatpush3.bf16.msra.mxu0 %v1752_v11  ;;  %1595 = vmatprep.mubr.msk.bf16.mxu0 %vm372_vm0, %v1742_v4  ;;  %v1245_v11 = vld [vmem:[#allocation2 + $0x78] sm:$0xff] }
  0x5f   : > { %1593 = vmatprep.subr.bf16.mxu0 %v1753_v15  ;;  %1623 = vmatprep.mubr.msk.bf16.mxu1 %vm372_vm0, %v1746_v8 }
  0x60   : > { %1651 = vmatpush1.bf16.msra.mxu1 %v1650_v44 }
  0x61   : > { %1652 = vmatprep.subr.bf16.mxu1 %v1858_v38 }
  0x62   : > { %1594 = vmatpush3.bf16.msra.mxu0 %v1753_v15  ;;  %v1665_v15 = vpack.c.bf16 %v1245_v11, %v1244_v10 }
  0x63   : > { %1632 = vmatprep.subr.bf16.mxu0 %v1631_v18 }
  0x64   : > { %1654 = vmatpush1.bf16.msra.mxu1 %v1653_v47  ;;  %v1251_v47 = vld [vmem:[#allocation2 + $0xa8] sm:$0xff] }
  0x65   : > { %1596 = vmatmul.mubr.msk.bf16.vlgmr.msra.gmra.mrb[20].mxu0 %vm372_vm0, %v1744_v6  ;;  %1624 = vmatmul.mubr.msk.bf16.gmra.mrb[20].mxu1 %vm372_vm0, %v1747_v12 }
  0x66   : > { %1599 = vmatprep.mubr.msk.bf16.mxu0 %vm372_vm0, %v1743_v5  ;;  %1627 = vmatprep.mubr.msk.bf16.mxu1 %vm372_vm0, %v1748_v13 }
  0x67   : > { %1634 = vmatpush1.bf16.msra.mxu0 %v1633_v21  ;;  %1655 = vmatprep.subr.bf16.mxu1 %v1858_v38 }
  0x68   : > { %1636 = vmatprep.subr.bf16.mxu0 %v1635_v24  ;;  %1657 = vmatpush1.bf16.msra.mxu1 %v1656_v51 }
  0x69   : > { %1658 = vmatprep.subr.bf16.mxu1 %v1858_v38 }
  0x6b   : > { %1638 = vmatpush1.bf16.msra.mxu0 %v1637_v28 }
  0x6c   : > { %1640 = vmatprep.subr.bf16.mxu0 %v1639_v33  ;;  %1660 = vmatpush1.bf16.msra.mxu1 %v1659_v58 }
  0x6d   : > { %1600 = vmatmul.mubr.msk.bf16.gmra.mrb[24].mxu0 %vm372_vm0, %v1745_v7  ;;  %1628 = vmatmul.mubr.msk.bf16.gmra.mrb[24].mxu1 %vm372_vm0, %v1749_v14  ;;  %v1662_v7 = vpack.c.bf16 %v1243_v62, %v1242_v61 }
  0x6e   : > { %1603 = vmatprep.mubr.msk.bf16.mxu0 %vm372_vm0, %v1746_v8  ;;  %1661 = vmatprep.subr.bf16.mxu1 %v1858_v38 }
  0x6f   : > { %1642 = vmatpush1.bf16.msra.mxu0 %v1641_v34  ;;  %v1248_v34 = vld [vmem:[#allocation2 + $0x90] sm:$0xff] }
  0x70   : > { %1663 = vmatpush1.bf16.msra.mxu1 %v1662_v7  ;;  %v1671_v42 = vpack.c.bf16 %v1249_v35, %v1248_v34 }
  0x71   : > { %1664 = vmatprep.subr.bf16.mxu1 %v1858_v38 }
  0x74   : > { %1666 = vmatpush1.bf16.msra.mxu1 %v1665_v15 }
  0x75   : > { %1604 = vmatmul.mubr.msk.bf16.gmra.mrb[28].mxu0 %vm372_vm0, %v1747_v12  ;;  %1667 = vmatprep.subr.bf16.mxu1 %v1858_v38 }
  0x76   : > { %1607 = vmatprep.mubr.msk.bf16.mxu0 %vm372_vm0, %v1748_v13 }
  0x78   : > { %1669 = vmatpush1.bf16.msra.mxu1 %v1668_v29 }
  0x79   : > { %1670 = vmatprep.subr.bf16.mxu1 %v1858_v38 }
  0x7c   : > { %1672 = vmatpush1.bf16.msra.mxu1 %v1671_v42 }
  0x7d   : > { %1608 = vmatmul.mubr.msk.bf16.gmra.mrb[32].mxu0 %vm372_vm0, %v1749_v14  ;;  %1673 = vmatprep.subr.bf16.mxu1 %v1858_v38  ;;  %vm1145_vm0 = vcmask 1043459  }
  0x7e   : > { %1221 = vmatprep.mubr.f32.mxu0 %v1857_v32 }
 0x110   : > { %v1557_v55 = vpop.f32.mrb[0].mxu0  ;;  %v1581_v57 = vpop.f32.mrb[0].mxu1 }
 0x111   : > { %v2099_v56 = vpop.f32.mrb[1].mxu0  ;;  %v591_v60 = vpop.f32.mrb[1].mxu1  ;;  %v496_v63 = vrot.slane %v1557_v55, 1 }
 0x112   : > { %v1558_v59 = vpop.f32.mrb[2].mxu0  ;;  %v1582_v2 = vpop.f32.mrb[2].mxu1  ;;  %v494_v3 = vrot.slane %v2099_v56, 1 }
 0x113   : > { %v497_v0 = vrot.slane %v1558_v59, 1  ;;  %v434_v1 = vpop.f32.mrb[3].mxu0  ;;  %v594_v5 = vpop.f32.mrb[3].mxu1 }
 0x114   : > { %v495_v4 = vrot.slane %v434_v1, 1 }
 0x115   : > { %v2106_v6 = vsel %vm512_vm1, %v496_v63, %v497_v0 }
 0x116   : > { %v2112_v8 = vsel %vm512_vm1, %v494_v3, %v495_v4  ;;  %v2116_v9 = vsel %vm512_vm1, %v495_v4, %v496_v63 }
 0x118   : > { %v1561_v12 = vpop.f32.mrb[4].mxu0  ;;  %v1585_v14 = vpop.f32.mrb[4].mxu1 }
 0x119   : > { %v447_v13 = vpop.f32.mrb[5].mxu0  ;;  %v607_v18 = vpop.f32.mrb[5].mxu1  ;;  %v500_v21 = vrot.slane %v1561_v12, 1 }
 0x11a   : > { %v498_v16 = vrot.slane %v447_v13, 1  ;;  %v1562_v17 = vpop.f32.mrb[6].mxu0  ;;  %v2120_v24 = vpop.f32.mrb[6].mxu1 }
 0x11b   : > { %v501_v22 = vrot.slane %v1562_v17, 1  ;;  %v450_v23 = vpop.f32.mrb[7].mxu0  ;;  %v610_v26 = vpop.f32.mrb[7].mxu1  ;;  %v1005_v17 = vand.u32 127, %v510_v48 }
 0x11c   : > { %v499_v25 = vrot.slane %v450_v23, 1  ;;  %v2124_v27 = vsel %vm512_vm1, %v497_v0, %v498_v16 }
 0x11d   : > { %v521_v28 = vsel %vm512_vm1, %v500_v21, %v501_v22  ;;  %vm1007_vm3 = vcmp.lt.s32.totalorder %v1005_v17, 16  ;;  %vm1010_vm4 = vcmp.ge.s32.totalorder %v1005_v17, 16  ;;  %vm1011_vm5 = vcmp.lt.s32.totalorder %v1005_v17, 32 }
 0x11e   : > { %v2128_v30 = vadd.f32 %v1581_v57, %v521_v28  ;;  %v523_v31 = vsel %vm512_vm1, %v498_v16, %v499_v25  ;;  %v522_v33 = vsel %vm512_vm1, %v499_v25, %v500_v21  ;;  %vm2210_vm6 = vmand %vm1010_vm4, %vm1011_vm5  ;;  %vm1014_vm7 = vcmp.ge.s32.totalorder %v1005_v17, 32 }
 0x11f   : > { %v2135_v36 = vadd.f32 %v591_v60, %v523_v31  ;;  %v2137_v37 = vadd.f32 %v594_v5, %v522_v33  ;;  %v1674_v60 = vpack.c.bf16 %v1251_v47, %v1250_v46  ;;  %vm1015_vm8 = vcmp.lt.s32.totalorder %v1005_v17, 48 }
 0x120   : > { %v1565_v39 = vpop.f32.mrb[8].mxu0  ;;  %v1589_v41 = vpop.f32.mrb[8].mxu1  ;;  %vm1016_vm9 = vmand %vm1014_vm7, %vm1015_vm8  ;;  %vm1153_vm4 = vcmask 1047559   ;;  %vm1262_vm5 = vcmask 588800  }
 0x121   : > { %v463_v40 = vpop.f32.mrb[9].mxu0  ;;  %v623_v45 = vpop.f32.mrb[9].mxu1  ;;  %v504_v49 = vrot.slane %v1565_v39, 1  ;;  %1675 = vmatpush1.bf16.msra.mxu1 %v1674_v60 }
 0x122   : > { %v502_v43 = vrot.slane %v463_v40, 1  ;;  %v1566_v44 = vpop.f32.mrb[10].mxu0  ;;  %v1590_v53 = vpop.f32.mrb[10].mxu1  ;;  %1676 = vmatprep.subr.bf16.mxu1 %v1858_v38 }
 0x123   : > { %v505_v50 = vrot.slane %v1566_v44, 1  ;;  %v466_v51 = vpop.f32.mrb[11].mxu0  ;;  %v626_v57 = vpop.f32.mrb[11].mxu1 }
 0x124   : > { %v520_v54 = vsel %vm512_vm1, %v501_v22, %v502_v43  ;;  %v503_v55 = vrot.slane %v466_v51, 1 }
 0x125   : > { %v2142_v58 = vadd.f32 %v1582_v2, %v520_v54  ;;  %v517_v59 = vsel %vm512_vm1, %v504_v49, %v505_v50 }
 0x126   : > { %v2146_v61 = vadd.f32 %v1585_v14, %v517_v59  ;;  %v519_v62 = vsel %vm512_vm1, %v502_v43, %v503_v55  ;;  %v518_v63 = vsel %vm512_vm1, %v503_v55, %v504_v49  ;;  %v1859_v55 = vmov 0  }
 0x127   : > { %v2153_v0 = vadd.f32 %v607_v18, %v519_v62  ;;  %v2155_v1 = vadd.f32 %v610_v26, %v518_v63 }
 0x128   : > { %v1569_v2 = vpop.f32.mrb[12].mxu0  ;;  %v1617_v5 = vpop.f32.mrb[12].mxu1 }
 0x129   : > { %v479_v4 = vpop.f32.mrb[13].mxu0  ;;  %v2157_v11 = vpop.f32.mrb[13].mxu1  ;;  %v508_v12 = vrot.slane %v1569_v2, 1  ;;  %v917_v15 = vrot.slane %v1617_v5, 3 }
 0x12a   : > { %v506_v7 = vrot.slane %v479_v4, 1  ;;  %v1570_v10 = vpop.f32.mrb[14].mxu0  ;;  %v1618_v16 = vpop.f32.mrb[14].mxu1  ;;  %v915_v20 = vrot.slane %v2157_v11, 3 }
 0x12b   : > { %v509_v13 = vrot.slane %v1570_v10, 1  ;;  %v482_v14 = vpop.f32.mrb[15].mxu0  ;;  %v918_v21 = vrot.slane %v1618_v16, 3  ;;  %v855_v22 = vpop.f32.mrb[15].mxu1 }
 0x12c   : > { %v516_v18 = vsel %vm512_vm1, %v505_v50, %v506_v7  ;;  %v507_v19 = vrot.slane %v482_v14, 1  ;;  %v916_v48 = vrot.slane %v855_v22, 3 }
 0x12d   : > { %v2166_v23 = vadd.f32 %v2120_v24, %v516_v18  ;;  %v513_v38 = vsel %vm512_vm1, %v508_v12, %v509_v13  ;;  %v528_v25 = vsel %vm512_vm1, %v509_v13, %v494_v3  ;;  %v2188_v56 = vsel %vm931_vm2, %v917_v15, %v918_v21 }
 0x12e   : > { %v2174_v26 = vadd.f32 %v1589_v41, %v513_v38  ;;  %v515_v28 = vsel %vm512_vm1, %v506_v7, %v507_v19  ;;  %v2178_v29 = vadd.f32 %v1590_v53, %v528_v25  ;;  %v514_v24 = vsel %vm512_vm1, %v507_v19, %v508_v12 }
 0x12f   : > { %v2182_v31 = vadd.f32 %v623_v45, %v515_v28  ;;  %v2184_v33 = vadd.f32 %v626_v57, %v514_v24  ;;  %v2192_v3 = vsel %vm931_vm2, %v916_v48, %v917_v15  ;;  %v2198_v35 = vsel %vm931_vm2, %v915_v20, %v916_v48 }
 0x130   : > { %v1577_v34 = vpop.f32.mrb[16].mxu0  ;;  %v1621_v41 = vpop.f32.mrb[16].mxu1  ;;  %v1009_v57 = vsel %vm1007_vm3, 14, %v1859_v55  ;;  %v1003_v25 = vadd.s32 8, %v2096_v52  ;;  %vm1147_vm1 = vcmask 1044484   ;;  %vm1151_vm3 = vcmask 1046534  }
 0x131   : > { %v584_v39 = vadd.f32 %v1577_v34, %v2106_v6  ;;  %v575_v40 = vpop.f32.mrb[17].mxu0  ;;  %v921_v44 = vrot.slane %v1621_v41, 3  ;;  %v868_v45 = vpop.f32.mrb[17].mxu1  ;;  %v1013_v2 = vsel %vm2210_vm6, 13, %v1009_v57 }
 0x132   : > { %v576_v42 = vadd.f32 %v575_v40, %v2112_v8  ;;  %v1578_v43 = vpop.f32.mrb[18].mxu0  ;;  %v919_v49 = vrot.slane %v868_v45, 3  ;;  %v1622_v50 = vpop.f32.mrb[18].mxu1  ;;  %v1017_v18 = vsel %vm1016_vm9, 12, %v1013_v2 }
 0x133   : > { %v2203_v46 = vadd.f32 %v1578_v43, %v2124_v27  ;;  %v578_v47 = vpop.f32.mrb[19].mxu0  ;;  %v922_v53 = vrot.slane %v1622_v50, 3  ;;  %v871_v6 = vpop.f32.mrb[19].mxu1  ;;  %v2252_v43 = vld [vmem:[%s2499_s2] ss:$0 sm:$0xff]  ;;  %vm2264_vm11 = vcmp.le.s32.totalorder %v2096_v52, %v1017_v18  ;;  %vm2270_vm13 = vcmp.le.s32.totalorder %v1003_v25, %v1017_v18 }
 0x134   : > { %v579_v51 = vadd.f32 %v578_v47, %v2116_v9  ;;  %v2208_v54 = vsel %vm931_vm2, %v918_v21, %v919_v49  ;;  %v920_v8 = vrot.slane %v871_v6, 3 }
 0x135   : > { %v2216_v27 = vsel %vm931_vm2, %v921_v44, %v922_v53 }
 0x136   : > { %v2220_v9 = vsel %vm931_vm2, %v920_v8, %v921_v44  ;;  %v2224_v60 = vsel %vm931_vm2, %v919_v49, %v920_v8 }
 0x138   : > { %v1597_v62 = vpop.f32.mrb[20].mxu0  ;;  %v1625_v4 = vpop.f32.mrb[20].mxu1 }
 0x139   : > { %v2226_v63 = vpop.f32.mrb[21].mxu0  ;;  %v925_v7 = vrot.slane %v1625_v4, 3  ;;  %v884_v10 = vpop.f32.mrb[21].mxu1  ;;  %v754_v12 = vrot.slane %v1597_v62, 2 }
 0x13a   : > { %v1598_v5 = vpop.f32.mrb[22].mxu0  ;;  %v923_v15 = vrot.slane %v884_v10, 3  ;;  %v1626_v16 = vpop.f32.mrb[22].mxu1  ;;  %v752_v17 = vrot.slane %v2226_v63, 2 }
 0x13b   : > { %v755_v13 = vrot.slane %v1598_v5, 2  ;;  %v692_v14 = vpop.f32.mrb[23].mxu0  ;;  %v926_v21 = vrot.slane %v1626_v16, 3  ;;  %v887_v22 = vpop.f32.mrb[23].mxu1 }
 0x13c   : > { %v753_v19 = vrot.slane %v692_v14, 2  ;;  %v2237_v48 = vsel %vm931_vm2, %v922_v53, %v923_v15  ;;  %v924_v28 = vrot.slane %v887_v22, 3 }
 0x13d   : > { %v781_v38 = vsel %vm768_vm10, %v754_v12, %v755_v13  ;;  %v2247_v41 = vsel %vm931_vm2, %v925_v7, %v926_v21 }
 0x13e   : > { %v787_v24 = vadd.f32 %v781_v38, %v584_v39  ;;  %v782_v34 = vsel %vm768_vm10, %v753_v19, %v754_v12  ;;  %v783_v40 = vsel %vm768_vm10, %v752_v17, %v753_v19  ;;  %v2256_v39 = vsel %vm931_vm2, %v924_v28, %v925_v7 }
 0x13f   : > { %v785_v44 = vadd.f32 %v783_v40, %v576_v42  ;;  %v786_v45 = vadd.f32 %v782_v34, %v579_v51  ;;  %v2260_v47 = vsel %vm931_vm2, %v923_v15, %v924_v28 }
 0x140   : > { %v950_v49 = vadd.f32 %v2188_v56, %v787_v24  ;;  %v1601_v53 = vpop.f32.mrb[24].mxu0  ;;  %v2274_v8 = vpop.f32.mrb[24].mxu1 }
 0x141   : > { %v948_v42 = vadd.f32 %v2198_v35, %v785_v44  ;;  %v949_v51 = vadd.f32 %v2192_v3, %v786_v45  ;;  %v705_v55 = vpop.f32.mrb[25].mxu0  ;;  %v758_v57 = vrot.slane %v1601_v53, 2  ;;  %v929_v59 = vrot.slane %v2274_v8, 3  ;;  %v2278_v2 = vpop.f32.mrb[25].mxu1 }
 0x142   : > { %v973_v56 = vadd.f32 %v2252_v43, %v950_v49  ;;  %v756_v62 = vrot.slane %v705_v55, 2  ;;  %v1602_v4 = vpop.f32.mrb[26].mxu0  ;;  %v927_v5 = vrot.slane %v2278_v2, 3  ;;  %v1630_v10 = vpop.f32.mrb[26].mxu1 }
 0x143   : > { %v971_v35 = vadd.f32 %v2252_v43, %v948_v42  ;;  %v972_v3 = vadd.f32 %v2252_v43, %v949_v51  ;;  %v759_v7 = vrot.slane %v1602_v4, 2  ;;  %v708_v12 = vpop.f32.mrb[27].mxu0  ;;  %v930_v16 = vrot.slane %v1630_v10, 3  ;;  %v2285_v19 = vpop.f32.mrb[27].mxu1 }
 0x144   : > { %v989_v14 = vmax.f32 %v973_v56, 0.0  ;;  %v780_v15 = vsel %vm768_vm10, %v755_v13, %v756_v62  ;;  %v757_v18 = vrot.slane %v708_v12, 2  ;;  %v2292_v28 = vsel %vm931_vm2, %v926_v21, %v927_v5 }
 0x145   : > { %v987_v22 = vmax.f32 %v971_v35, 0.0  ;;  %v988_v38 = vmax.f32 %v972_v3, 0.0  ;;  %v788_v25 = vadd.f32 %v780_v15, %v2203_v46  ;;  %v777_v13 = vsel %vm768_vm10, %v758_v57, %v759_v7 }
 0x146   : > { %v1022_v24 = vsel %vm2264_vm11, %v989_v14, 0.0  ;;  %v2302_v34 = vsel %vm931_vm2, %v929_v59, %v930_v16  ;;  %v2308_v46 = vsel %vm931_vm2, %v930_v16, %v915_v20  ;;  %v791_v11 = vadd.f32 %v777_v13, %v2128_v30 }
 0x147   : > { %v1046_v21 = vsel %vm1036_vm12, %v1022_v24, -inf  ;;  %v1020_v40 = vsel %vm2264_vm11, %v987_v22, 0.0  ;;  %v1021_v44 = vsel %vm2270_vm13, %v988_v38, 0.0  ;;  %v951_v45 = vadd.f32 %v2208_v54, %v788_v25 }
 0x148   : > { %v1037_v49 = vsel %vm1036_vm12, %v1020_v40, -inf  ;;  %v1038_v53 = vsel %vm1036_vm12, %v1021_v44, -inf  ;;  %v778_v20 = vsel %vm768_vm10, %v757_v18, %v758_v57  ;;  %v1605_v42 = vpop.f32.mrb[28].mxu0  ;;  %v779_v56 = vsel %vm768_vm10, %v756_v62, %v757_v18 }
 0x149   : > { %v1039_v51 = vmax.f32 %v1037_v49, %v1038_v53  ;;  %v974_v55 = vadd.f32 %v2252_v43, %v951_v45  ;;  %v790_v4 = vadd.f32 %v778_v20, %v2137_v37  ;;  %v721_v35 = vpop.f32.mrb[29].mxu0  ;;  %v954_v54 = vadd.f32 %v2216_v27, %v791_v11 }
 0x14a   : > { %v789_v3 = vadd.f32 %v779_v56, %v2135_v36  ;;  %v762_v10 = vrot.slane %v1605_v42, 2  ;;  %v760_v12 = vrot.slane %v721_v35, 2  ;;  %v2327_v30 = vpop.f32.mrb[30].mxu0 }
 0x14b   : > { %v1040_v14 = vrot.slane %v1039_v51, 4  ;;  %v990_v57 = vmax.f32 %v974_v55, 0.0  ;;  %v953_v15 = vadd.f32 %v2220_v9, %v790_v4  ;;  %v763_v16 = vrot.slane %v2327_v30, 2  ;;  %v724_v22 = vpop.f32.mrb[31].mxu0 }
 0x14c   : > { %v977_v62 = vadd.f32 %v2252_v43, %v954_v54  ;;  %v952_v37 = vadd.f32 %v2224_v60, %v789_v3  ;;  %v776_v27 = vsel %vm768_vm10, %v759_v7, %v760_v12  ;;  %v761_v18 = vrot.slane %v724_v22, 2 }
 0x14d   : > { %v1041_v36 = vmax.f32 %v1039_v51, %v1040_v14  ;;  %v1023_v38 = vsel %vm2270_vm13, %v990_v57, 0.0  ;;  %v976_v25 = vadd.f32 %v2252_v43, %v953_v15  ;;  %v792_v24 = vadd.f32 %v776_v27, %v2142_v58 }
 0x14e   : > { %v1047_v9 = vsel %vm1036_vm12, %v1023_v38, -inf  ;;  %v993_v13 = vmax.f32 %v977_v62, 0.0  ;;  %v975_v40 = vadd.f32 %v2252_v43, %v952_v37  ;;  %v773_v60 = vsel %vm768_vm10, %v762_v10, %v763_v16 }
 0x14f   : > { %v1042_v44 = vrot.slane %v1041_v36, 2  ;;  %v1048_v45 = vmax.f32 %v1046_v21, %v1047_v9  ;;  %v992_v7 = vmax.f32 %v976_v25, 0.0  ;;  %v955_v49 = vadd.f32 %v2237_v48, %v792_v24 }
 0x150   : > { %v991_v53 = vmax.f32 %v975_v40, 0.0  ;;  %v795_v11 = vadd.f32 %v773_v60, %v2146_v61  ;;  %v774_v20 = vsel %vm768_vm10, %v761_v18, %v762_v10  ;;  %v2347_v58 = vpop.f32.mrb[32].mxu0  ;;  %v1026_v55 = vsel %vm2264_vm11, %v993_v13, 0.0 }
 0x151   : > { %v1043_v42 = vmax.f32 %v1041_v36, %v1042_v44  ;;  %v1049_v51 = vrot.slane %v1048_v45, 4  ;;  %v1025_v56 = vsel %vm2270_vm13, %v992_v7, 0.0  ;;  %v2353_v21 = vpop.f32.mrb[33].mxu0  ;;  %v978_v4 = vadd.f32 %v2252_v43, %v955_v49 }
 0x152   : > { %v1024_v48 = vsel %vm2264_vm11, %v991_v53, 0.0  ;;  %v1056_v61 = vsel %vm1036_vm12, %v1025_v56, -inf  ;;  %v958_v35 = vadd.f32 %v2247_v41, %v795_v11  ;;  %v1610_v54 = vpop.f32.mrb[34].mxu0  ;;  %v775_v14 = vsel %vm768_vm10, %v760_v12, %v761_v18 }
 0x153   : > { %v1044_v3 = vrot.slane %v1043_v42, 1  ;;  %v1050_v10 = vmax.f32 %v1048_v45, %v1049_v51  ;;  %v1055_v30 = vsel %vm1036_vm12, %v1024_v48, -inf  ;;  %v740_v57 = vpop.f32.mrb[35].mxu0  ;;  %v994_v22 = vmax.f32 %v978_v4, 0.0 }
 0x154   : > { %v1057_v15 = vmax.f32 %v1055_v30, %v1056_v61  ;;  %v981_v62 = vadd.f32 %v2252_v43, %v958_v35  ;;  %v793_v37 = vadd.f32 %v775_v14, %v2153_v0  ;;  %v1064_v41 = vsel %vm1036_vm12, %v1026_v55, -inf }
 0x155   : > { %v2365_v27 = vmax.f32 %v1043_v42, %v1044_v3  ;;  %v1051_v36 = vrot.slane %v1050_v10, 2  ;;  %v794_v38 = vadd.f32 %v774_v20, %v2155_v1  ;;  %v1027_v24 = vsel %vm2270_vm13, %v994_v22, 0.0 }
 0x156   : > { %v1058_v25 = vrot.slane %v1057_v15, 4  ;;  %v997_v9 = vmax.f32 %v981_v62, 0.0  ;;  %v956_v12 = vadd.f32 %v2260_v47, %v793_v37  ;;  %v1065_v13 = vsel %vm1036_vm12, %v1027_v24, -inf }
 0x157   : > { %v1052_v18 = vmax.f32 %v1050_v10, %v1051_v36  ;;  %v957_v40 = vadd.f32 %v2256_v39, %v794_v38  ;;  %v764_v0 = vrot.slane %v2353_v21, 2  ;;  %v1066_v44 = vmax.f32 %v1064_v41, %v1065_v13 }
 0x158   : > { %v1059_v60 = vmax.f32 %v1057_v15, %v1058_v25  ;;  %v1030_v45 = vsel %vm2264_vm11, %v997_v9, 0.0  ;;  %v979_v1 = vadd.f32 %v2252_v43, %v956_v12  ;;  %v766_v53 = vrot.slane %v2347_v58, 2 }
 0x159   : > { %v1053_v7 = vrot.slane %v1052_v18, 1  ;;  %v980_v49 = vadd.f32 %v2252_v43, %v957_v40  ;;  %v772_v47 = vsel %vm768_vm10, %v763_v16, %v764_v0  ;;  %v1067_v20 = vrot.slane %v1066_v44, 4 }
 0x15a   : > { %v1060_v11 = vrot.slane %v1059_v60, 2  ;;  %v995_v39 = vmax.f32 %v979_v1, 0.0  ;;  %v796_v42 = vadd.f32 %v772_v47, %v2166_v23  ;;  %v1082_v51 = vsel %vm1036_vm12, %v1030_v45, -inf }
 0x15b   : > { %v996_v55 = vmax.f32 %v980_v49, 0.0  ;;  %v767_v56 = vrot.slane %v1610_v54, 2  ;;  %v765_v21 = vrot.slane %v740_v57, 2  ;;  %v1068_v61 = vmax.f32 %v1066_v44, %v1067_v20 }
 0x15c   : > { %v1061_v48 = vmax.f32 %v1059_v60, %v1060_v11  ;;  %v1028_v4 = vsel %vm2264_vm11, %v995_v39, 0.0  ;;  %v959_v58 = vadd.f32 %v2292_v28, %v796_v42  ;;  %v1054_v3 = vmax.f32 %v1052_v18, %v1053_v7 }
 0x15d   : > { %v1029_v16 = vsel %vm2270_vm13, %v996_v55, 0.0  ;;  %v1073_v35 = vsel %vm1036_vm12, %v1028_v4, -inf  ;;  %v769_v23 = vsel %vm768_vm10, %v766_v53, %v767_v56  ;;  %v784_v54 = vsel %vm768_vm10, %v767_v56, %v752_v17 }
 0x15e   : > { %v1069_v10 = vrot.slane %v1068_v61, 2  ;;  %v1074_v30 = vsel %vm1036_vm12, %v1029_v16, -inf  ;;  %v982_v14 = vadd.f32 %v2252_v43, %v959_v58  ;;  %v799_v57 = vadd.f32 %v769_v23, %v2174_v26 }
 0x15f   : > { %v1075_v28 = vmax.f32 %v1073_v35, %v1074_v30  ;;  %v800_v15 = vadd.f32 %v784_v54, %v2178_v29  ;;  %v770_v22 = vsel %vm768_vm10, %v765_v21, %v766_v53  ;;  %v1062_v63 = vrot.slane %v1061_v48, 1 }
 0x160   : > { %v1070_v62 = vmax.f32 %v1068_v61, %v1069_v10  ;;  %v998_v37 = vmax.f32 %v982_v14, 0.0  ;;  %v771_v17 = vsel %vm768_vm10, %v764_v0, %v765_v21  ;;  %v962_v41 = vadd.f32 %v2302_v34, %v799_v57 }
 0x161   : > { %v1076_v36 = vrot.slane %v1075_v28, 4  ;;  %v963_v38 = vadd.f32 %v2308_v46, %v800_v15  ;;  %v797_v25 = vadd.f32 %v771_v17, %v2182_v31  ;;  %v798_v24 = vadd.f32 %v770_v22, %v2184_v33 }
 0x162   : > { %v1071_v26 = vrot.slane %v1070_v62, 1  ;;  %v1031_v29 = vsel %vm2270_vm13, %v998_v37, 0.0  ;;  %v928_v9 = vrot.slane %v2285_v19, 3  ;;  %v985_v13 = vadd.f32 %v2252_v43, %v962_v41 }
 0x163   : > { %v1077_v12 = vmax.f32 %v1075_v28, %v1076_v36  ;;  %v1083_v18 = vsel %vm1036_vm12, %v1031_v29, -inf  ;;  %v986_v40 = vadd.f32 %v2252_v43, %v963_v38  ;;  %v1063_v34 = vmax.f32 %v1061_v48, %v1062_v63  ;;  %v1252_v38 = vld [vmem:[#allocation2 + $0xb0] sm:$0xff]  ;;  %v1254_v29 = vld [vmem:[#allocation2 + $0xc0] sm:$0xff] }
 0x164   : > { %v1084_v0 = vmax.f32 %v1082_v51, %v1083_v18  ;;  %v933_v31 = vsel %vm931_vm2, %v928_v9, %v929_v59  ;;  %v934_v33 = vsel %vm931_vm2, %v927_v5, %v928_v9  ;;  %v1001_v46 = vmax.f32 %v985_v13, 0.0  ;;  %v1121_v9 = vld [vmem:[%s2501_s4] sm:$0x3] }
 0x165   : > { %v1078_v19 = vrot.slane %v1077_v12, 2  ;;  %v1002_v60 = vmax.f32 %v986_v40, 0.0  ;;  %v960_v44 = vadd.f32 %v934_v33, %v797_v25  ;;  %v1072_v45 = vmax.f32 %v1070_v62, %v1071_v26  ;;  %v1253_v25 = vld [vmem:[#allocation2 + $0xb8] sm:$0xff] }
 0x166   : > { %v1085_v1 = vrot.slane %v1084_v0, 4  ;;  %v961_v7 = vadd.f32 %v933_v31, %v798_v24  ;;  %v1142_v49 = vsel %vm1141_vm14, %v1054_v3, %v2365_v27  ;;  %v1034_v8 = vsel %vm2264_vm11, %v1001_v46, 0.0 }
 0x167   : > { %v1079_v53 = vmax.f32 %v1077_v12, %v1078_v19  ;;  %v1035_v59 = vsel %vm2270_vm13, %v1002_v60, 0.0  ;;  %v983_v2 = vadd.f32 %v2252_v43, %v960_v44  ;;  %v1100_v47 = vsel %vm1036_vm12, %v1034_v8, -inf }
 0x168   : > { %v1086_v5 = vmax.f32 %v1084_v0, %v1085_v1  ;;  %v1101_v11 = vsel %vm1036_vm12, %v1035_v59, -inf  ;;  %v984_v20 = vadd.f32 %v2252_v43, %v961_v7  ;;  %v1144_v27 = vsel %vm1143_vm15, %v1063_v34, %v1142_v49 }
 0x169   : > { %v1080_v39 = vrot.slane %v1079_v53, 1  ;;  %v1102_v42 = vmax.f32 %v1100_v47, %v1101_v11  ;;  %v999_v51 = vmax.f32 %v983_v2, 0.0  ;;  %v1146_v21 = vsel %vm1145_vm0, %v1072_v45, %v1144_v27 }
 0x16a   : > { %v1087_v55 = vrot.slane %v1086_v5, 2  ;;  %v1000_v56 = vmax.f32 %v984_v20, 0.0  ;;  %vm1149_vm2 = vcmask 1045509   ;;  %v1677_v26 = vpack.c.bf16 %v1253_v25, %v1252_v38 }
 0x16b   : > { %v1103_v48 = vrot.slane %v1102_v42, 4  ;;  %v1032_v61 = vsel %vm2264_vm11, %v999_v51, 0.0  ;;  %v1081_v4 = vmax.f32 %v1079_v53, %v1080_v39  ;;  %v1125_v24 = vsub.s32 0, %v2096_v52 }
 0x16c   : > { %v1088_v58 = vmax.f32 %v1086_v5, %v1087_v55  ;;  %v1033_v16 = vsel %vm2270_vm13, %v1000_v56, 0.0  ;;  %v1091_v43 = vsel %vm1036_vm12, %v1032_v61, -inf  ;;  %1678 = vmatpush1.bf16.msra.mxu1 %v1677_v26  ;;  %v1129_v12 = vsub.s32 1, %v2096_v52 }
 0x16d   : > { %v1104_v35 = vmax.f32 %v1102_v42, %v1103_v48  ;;  %v1092_v23 = vsel %vm1036_vm12, %v1033_v16, -inf  ;;  %v1148_v54 = vsel %vm1147_vm1, %v1081_v4, %v1146_v21  ;;  %1314 = vmatprep.subr.mxu1 %v1857_v32  ;;  %v1126_v18 = vrot.slane %v1121_v9, %v1125_v24  ;;  %v1505_v32 = vld [vmem:[%s2503_s6] ss:$0 sm:$0xff] }
 0x16e   : > { %v1093_v3 = vmax.f32 %v1091_v43, %v1092_v23  ;;  %v1089_v10 = vrot.slane %v1088_v58, 1  ;;  %v1130_v13 = vrot.slane %v1121_v9, %v1129_v12 }
 0x16f   : > { %v1105_v30 = vrot.slane %v1104_v35, 2 }
 0x170   : > { %v1094_v14 = vrot.slane %v1093_v3, 4  ;;  %v1090_v28 = vmax.f32 %v1088_v58, %v1089_v10  ;;  %1315 = vmatpush1.msra.mxu1 %v1254_v29 }
 0x171   : > { %v1106_v15 = vmax.f32 %v1104_v35, %v1105_v30 }
 0x172   : > { %v1095_v57 = vmax.f32 %v1093_v3, %v1094_v14  ;;  %v1150_v50 = vsel %vm1149_vm2, %v1090_v28, %v1148_v54 }
 0x173   : > { %v1107_v62 = vrot.slane %v1106_v15, 1 }
 0x174   : > { %v1096_v22 = vrot.slane %v1095_v57, 2 }
 0x175   : > { %v1108_v17 = vmax.f32 %v1106_v15, %v1107_v62 }
 0x176   : > { %v1097_v63 = vmax.f32 %v1095_v57, %v1096_v22 }
 0x178   : > { %v1098_v6 = vrot.slane %v1097_v63, 1 }
 0x17a   : > { %v1099_v37 = vmax.f32 %v1097_v63, %v1098_v6 }
 0x17c   : > { %v1152_v36 = vsel %vm1151_vm3, %v1099_v37, %v1150_v50 }
 0x17d   : > { %v1154_v41 = vsel %vm1153_vm4, %v1108_v17, %v1152_v36 }
 0x17e   : > { %1504 = vmatmul.mubr.msk.f32.vlgmr.msra.gmra.mrb[36].mxu0 %vm1036_vm12, %v1154_v41 }
 0x251   : > { %v1223_v40 = vpop.f32.mrb[36].mxu0 }
 0x252   : > { %v1224_v34 = vadd.f32 %v1223_v40, %v1126_v18  ;;  %v1225_v0 = vpop.f32.mrb[37].mxu0 }
 0x253   : > { %v1226_v31 = vadd.f32 %v1225_v0, %v1130_v13 }
 0x254   : > { %v1228_v19 = vmax.f32 %v1224_v34, 0.0 }
 0x255   : > { %v1229_v33 = vmax.f32 %v1226_v31, 0.0 }
 0x257   : > { %1506 = vmatprep.mubr.msk.f32.mxu1 %vm1262_vm5, %v1229_v33 }
 0x258   : > { %1331 = vmatmul.mubr.f32.vlgmr.msra.gmra.mrb[28].mxu1 %v1228_v19 }
 0x32b   : > { %v1332_v46 = vpop.f32.mrb[28].mxu1 }
 0x32c   : > { %v1333_v60 = vadd.f32 %v1505_v32, %v1332_v46  ;;  %v1334_v52 = vpop.f32.mrb[29].mxu1 }
 0x32e   : > { %1336 = vmax.xlane.f32.xlu0 %v1333_v60 }
 0x3bb   : > { %v1337_v44 = vpop.xlane.xlu0 %1336 }
 0x3bc   : > { %v1338_v45 = vsub.f32 %v1333_v60, %v1337_v44 }
 0x3be   : > { %v1339_v1 = vmul.f32 1.442695, %v1338_v45 }
 0x3c0   : > { %1754 = vpow2.f32 %v1339_v1 }
 0x3ca   : > { %v1755_v7 = vpop.eup %1754 }
 0x3cb   : > { %1341 = vadd.xlane.f32.xlu0 %v1755_v7 }
 0x458   : > { %v1342_v49 = vpop.xlane.xlu0 %1341 }
 0x459   : > { %1756 = vrcp.f32 %v1342_v49 }
 0x463   : > { %v1757_v53 = vpop.eup %1756 }
 0x464   : > { %v1344_v8 = vmul.f32 %v1757_v53, %v1342_v49 }
 0x466   : > { %v1345_v59 = vsub.f32 2.0, %v1344_v8 }
 0x468   : > { %v1346_v2 = vmul.f32 %v1757_v53, %v1345_v59 }
 0x46a   : > { %v1347_v5 = vmul.f32 %v1755_v7, %v1346_v2 }
 0x46c   : > { %1348 = vst [vmem:[%s287_s14] sm:$0xff] %v1347_v5 }
 0x46d   : > { %1799 = shalt.err (!%p1796_p7)
}
 0x46e   : > { %s1800_s22 = scalar_lea.hbm %s2455_s20, 128  ;;  %s1804_s8 = scalar_lea.hbm %s2504_s7, 256 }
 0x46f   : > { %p1801_p8 = scmp.ne.s32.totalorder %s2455_s20, %s1800_s22  ;;  %p1805_p1 = scmp.lt.u32.totalorder %s2455_s20, %s2504_s7 }
 0x470   : > { %p1806_p0 = scmp.lt.u32.totalorder %s1804_s8, %s1800_s22  ;;  %p1808_p6 = scmp.lt.u32.totalorder %s1800_s22, %s2455_s20 }
 0x471   : > { %p1802_p11 = pnand %p1801_p8, %p2521_p9 }
 0x472   : > { %p1807_p5 = por %p1806_p0, %p1805_p1 }
 0x473   : > { %p1803_p13 = pneg %p1802_p11 }
 0x474   : > { %p1809_p10 = por %p1808_p6, %p1807_p5 }
 0x476   : > { %p1810_p12 = pnand %p1809_p10, %p1803_p13 }
 0x478   : > { %1813 = shalt.err (!%p1810_p12)
}
 0x479   : > { %1687 = dma.vmem_to_hbm [thread:$0]  (%p2521_p9), %s2457_s17, 128, %s2455_s20, %s1350_s16  }
 0x47a PF: > { %p1699_p2 = scmp.ge.s32.totalorder %s1852_s27, 2  ;;  %s1375_s18 = sand.u32 1, %s1840_s24  }
 0x47b   : > { %p2522_p3 = scmp.ne.s32.totalorder %s2509_s12, 0  ;;  %s1376_s19 = scalar_lea.sflag [#allocation4], %s1375_s18 }
 0x47d   : > { %p1694_p4 = pnand %p1699_p2, %p2522_p3 }
 0x47f   : > { %1835 = dma.done.wait (!%p1694_p4), %s1376_s19, 128  }
 0x480   : > { %1837 = vsyncadd (!%p1694_p4), %s1376_s19, 4294967168  ;;  %p18_p7 = scmp.ge.s32.totalorder %s1926_s30, 4   ;;  %s2523_s24 = smov %s1844_s25 }
 0x481   : > { %s2524_s25 = smov %s1848_s26  ;;  %s2525_s26 = smov %s1937_s10 }
 0x482   : > { %s2526_s27 = smov %s1926_s30  ;;  %20 = sbr.rel (!%p18_p7) target bundleno = 4 (0x4), region = 91 }
 0x489   :  { %1381 = vsyncpa [#allocation3], 1 }
 0x48a   :  { %1383 = vsyncpa [#allocation3 + $0x1], 1 }
 0x48b   :  { %1384 = vsyncpa [#allocation4], 1 }
 0x48c   :  { %1386 = vsyncpa [#allocation4 + $0x1], 1 }

</bundles_post_ra>
